<compile_context>
chip_gen: v6e
topology: v6e:2x2x1
jax: 0.10.0
libtpu: 0.0.40
codegen_flags: <defaults>
</compile_context>

<pallas_src>
import jax
import jax.numpy as jnp
from jax.experimental import pallas as pl
from jax.experimental.pallas import tpu as pltpu


def mlp_kernel(x_ref, w1_ref, w2_ref, o_ref):
    # x_ref:  (1, TILE_N) f32 -- batch elements on the lane axis
    # w1_ref: (8, 1)      f32 -- fc1.weight (out_features, in_features)
    # w2_ref: (8, 1)      f32 -- fc2.weight pre-transposed to a column vector
    # o_ref:  (1, TILE_N) f32
    x = x_ref[...]
    w1 = w1_ref[...]
    w2 = w2_ref[...]

    # fc1 with K=1 contraction == outer product == broadcast multiply (VPU).
    h = w1 * x                                    # (8, TILE_N)
    # Numerically robust sigmoid; transcendental goes to the EUP slot.
    h = jax.nn.sigmoid(h)
    # fc2 == weighted sum over the 8 hidden units (sublane reduction, XLU).
    y = jnp.sum(h * w2, axis=0, keepdims=True)    # (1, TILE_N)
    o_ref[...] = y.astype(o_ref.dtype)


def net_forward(x, w1, w2, *, tile_n=1024):
    """Forward pass of Net.

    x:  (N, 1) f32  (PyTorch nn.Linear input layout)
    w1: (8, 1) f32  (fc1.weight, (out, in))
    w2: (1, 8) f32  (fc2.weight, (out, in))
    returns (N, 1) f32
    """
    n = x.shape[0]
    lanes = 128
    # Pad batch to a lane-dense multiple of 128; pick a tile <= tile_n.
    n_128 = ((n + lanes - 1) // lanes) * lanes
    tile = min(tile_n, n_128)
    n_pad = ((n_128 + tile - 1) // tile) * tile

    # Layout plumbing in the wrapper (zero kernel cost): batch -> lanes,
    # fc2 weight pre-transposed to a column vector.
    x_lane = jnp.zeros((1, n_pad), x.dtype).at[0, :n].set(x[:, 0])
    w2_col = w2.T  # (8, 1)

    grid = (n_pad // tile,)
    out = pl.pallas_call(
        mlp_kernel,
        out_shape=jax.ShapeDtypeStruct((1, n_pad), x.dtype),
        grid=grid,
        in_specs=[
            pl.BlockSpec((1, tile), lambda i: (0, i), memory_space=pltpu.VMEM),
            pl.BlockSpec((8, 1), lambda i: (0, 0), memory_space=pltpu.VMEM),
            pl.BlockSpec((8, 1), lambda i: (0, 0), memory_space=pltpu.VMEM),
        ],
        out_specs=pl.BlockSpec((1, tile), lambda i: (0, i),
                               memory_space=pltpu.VMEM),
        compiler_params=pltpu.CompilerParams(
            dimension_semantics=("parallel",)),
    )(x_lane, w1, w2_col)

    return out[0, :n].reshape(n, 1)


if __name__ == "__main__":
    key = jax.random.PRNGKey(0)
    kx, k1, k2, kx2 = jax.random.split(key, 4)

    # Deterministic params matching nn.Linear(1, 8) / nn.Linear(8, 1), no bias.
    w1 = jax.random.uniform(k1, (8, 1), dtype=jnp.float32,
                            minval=-1.0, maxval=1.0)
    w2 = jax.random.uniform(k2, (1, 8), dtype=jnp.float32,
                            minval=-1.0 / jnp.sqrt(8.0),
                            maxval=1.0 / jnp.sqrt(8.0))

    def ref(x):
        return jax.nn.sigmoid(x @ w1.T) @ w2.T

    # Small batch consistent with the module (in_features = 1).
    x_small = jax.random.normal(kx, (8, 1), dtype=jnp.float32)
    out_small = net_forward(x_small, w1, w2)
    jax.block_until_ready(out_small)
    assert out_small.shape == (8, 1)
    assert jnp.allclose(out_small, ref(x_small), atol=1e-5, rtol=1e-5)

    # Ragged larger batch to exercise lane padding + multi-tile grid path.
    x_big = jax.random.normal(kx2, (300, 1), dtype=jnp.float32)
    out_big = net_forward(x_big, w1, w2, tile_n=128)
    jax.block_until_ready(out_big)
    assert out_big.shape == (300, 1)
    assert jnp.allclose(out_big, ref(x_big), atol=1e-5, rtol=1e-5)

    print("KERNEL_OK")
</pallas_src>

<mosaic_0001>
module attributes {stable_mosaic.version = 11 : i64} {
  func.func @mlp_kernel(%arg0: i32, %arg1: memref<1x128xf32, #tpu.memory_space<vmem>>, %arg2: memref<8x1xf32, #tpu.memory_space<vmem>>, %arg3: memref<8x1xf32, #tpu.memory_space<vmem>>, %arg4: memref<1x128xf32, #tpu.memory_space<vmem>>) attributes {dimension_semantics = [#tpu.dimension_semantics<parallel>], iteration_bounds = array<i64: 1>, scalar_prefetch = 0 : i64, scratch_operands = 0 : i64, tpu.core_type = #tpu.core_type<tc>, window_params = [{transform_indices = @transform_0, window_bounds = array<i64: 1, 128>}, {pipeline_mode = #tpu.pipeline_mode<synchronous>, transform_indices = @transform_1, window_bounds = array<i64: 8, 1>}, {pipeline_mode = #tpu.pipeline_mode<synchronous>, transform_indices = @transform_2, window_bounds = array<i64: 8, 1>}, {transform_indices = @transform_3, window_bounds = array<i64: 1, 128>}]} {
    %c0 = arith.constant 0 : index
    %c0_0 = arith.constant 0 : index
    %0 = vector.load %arg1[%c0, %c0_0] : memref<1x128xf32, #tpu.memory_space<vmem>>, vector<1x128xf32>
    %c0_1 = arith.constant 0 : index
    %c0_2 = arith.constant 0 : index
    %1 = vector.load %arg2[%c0_1, %c0_2] : memref<8x1xf32, #tpu.memory_space<vmem>>, vector<8x1xf32>
    %c0_3 = arith.constant 0 : index
    %c0_4 = arith.constant 0 : index
    %2 = vector.load %arg3[%c0_3, %c0_4] : memref<8x1xf32, #tpu.memory_space<vmem>>, vector<8x1xf32>
    %3 = vector.broadcast %1 : vector<8x1xf32> to vector<8x128xf32>
    %4 = vector.broadcast %0 : vector<1x128xf32> to vector<8x128xf32>
    %5 = arith.mulf %3, %4 : vector<8x128xf32>
    %6 = arith.negf %5 : vector<8x128xf32>
    %7 = math.exp %6 : vector<8x128xf32>
    %cst = arith.constant 1.000000e+00 : f32
    %8 = vector.broadcast %cst : f32 to vector<8x128xf32>
    %9 = arith.addf %8, %7 : vector<8x128xf32>
    %10 = arith.divf %8, %9 : vector<8x128xf32>
    %11 = vector.broadcast %2 : vector<8x1xf32> to vector<8x128xf32>
    %12 = arith.mulf %10, %11 : vector<8x128xf32>
    %cst_5 = arith.constant dense<0.000000e+00> : vector<128xf32>
    %13 = vector.multi_reduction <add>, %12, %cst_5 [0] : vector<8x128xf32> to vector<128xf32>
    %14 = vector.shape_cast %13 : vector<128xf32> to vector<1x128xf32>
    %c0_6 = arith.constant 0 : index
    %c0_7 = arith.constant 0 : index
    %15 = vector.load %arg4[%c0_6, %c0_7] : memref<1x128xf32, #tpu.memory_space<vmem>>, vector<1x128xf32>
    tpu.vector_store %arg4[%c0_6, %c0_7], %14 {strides = array<i32>} : memref<1x128xf32, #tpu.memory_space<vmem>>, vector<1x128xf32>,
    return
  }
  func.func @transform_0(%arg0: i32) -> (i32, i32) {
    %c0_i32 = arith.constant 0 : i32
    %c0_i32_0 = arith.constant 0 : i32
    return %c0_i32, %arg0 : i32, i32
  }
  func.func @transform_1(%arg0: i32) -> (i32, i32) {
    %c0_i32 = arith.constant 0 : i32
    %c0_i32_0 = arith.constant 0 : i32
    %c0_i32_1 = arith.constant 0 : i32
    return %c0_i32, %c0_i32_0 : i32, i32
  }
  func.func @transform_2(%arg0: i32) -> (i32, i32) {
    %c0_i32 = arith.constant 0 : i32
    %c0_i32_0 = arith.constant 0 : i32
    %c0_i32_1 = arith.constant 0 : i32
    return %c0_i32, %c0_i32_0 : i32, i32
  }
  func.func @transform_3(%arg0: i32) -> (i32, i32) {
    %c0_i32 = arith.constant 0 : i32
    %c0_i32_0 = arith.constant 0 : i32
    return %c0_i32, %arg0 : i32, i32
  }
}

</mosaic_0001>

<bundles_post_ra>
// kernel: tpu_custom_call.1
= control target key start
LH: loop header
LB: loop body
LE: loop exit
PB: predicated region body
PF: predicated region fallthrough
CT: control target
= control target key end

     0   :  { %v94_v1 = vmov 0   ;;  %s128_s0 = inlined_call_operand.vmem [shape: f32[1,128], index: 0, kind: input, shape index: {}]   ;;  %s129_s1 = inlined_call_operand.vmem [shape: f32[8,1], index: 1, kind: input, shape index: {}]   ;;  %s130_s2 = inlined_call_operand.vmem [shape: f32[8,1], index: 2, kind: input, shape index: {}]   ;;  %s131_s3 = inlined_call_operand.hbm [shape: f32[1,128], index: 3, kind: output, shape index: {}]  }
   0x1   :  { %v16_v0 = vld [vmem:[%s129_s1] sm:$0xff]  ;;  %67 = vset.pattern.permute.xlu0 %v94_v1 }
   0x2   :  { %8 = vsyncpa [#allocation3], 0  ;;  %20 = vperm.xlu0 %67, %v16_v0   ;;  %v17_v2 = vld [vmem:[%s130_s2] sm:$0xff]  ;;  %s95_s1 = smov [#allocation2]  }
   0x3   :  { %v63_v3 = vld [vmem:[%s128_s0] ss:$0 sm:$0xff]  ;;  %s55_s2 = sshll.u32 %s95_s1, 4  ;;  %s56_s2 = int_to_ptr.vmem [resolvable:$true] %s55_s2 }
   0x4   :  { %s72_s0 = scalar_lea.vmem %s56_s2, 16  ;;  %s76_s18 = scalar_lea.vmem %s56_s2, 32 }
   0x5   :  { %p73_p0 = scmp.ne.s32.totalorder %s56_s2, %s72_s0  ;;  %p77_p1 = scmp.lt.s32.totalorder %s56_s2, %s56_s2 }
   0x6   :  { %38 = vperm.xlu0 %67, %v17_v2   ;;  %p78_p2 = scmp.lt.s32.totalorder %s76_s18, %s72_s0 }
   0x8   :  { %p79_p3 = por %p78_p2, %p77_p1 }
   0xa   :  { %p80_p4 = pnand %p79_p3, %p73_p0 }
  0x7d   :  { %v21_v4 = vpop.permute.xlu0 %20 }
  0x7e   :  { %v29_v5 = vmul.f32 %v63_v3, %v21_v4 }
  0x80   :  { %v64_v6 = vmul.f32 -1.442695, %v29_v5 }
  0x81   :  { %v39_v10 = vpop.permute.xlu0 %38 }
  0x82   :  { %68 = vpow2.f32 %v64_v6 }
  0x8f   :  { %v69_v7 = vpop.eup %68 }
  0x90   :  { %v33_v8 = vadd.f32 1.0, %v69_v7 }
  0x92   :  { %70 = vrcp.f32 %v33_v8 }
  0x9f   :  { %v71_v9 = vpop.eup %70 }
  0xa0   :  { %v41_v11 = vmul.f32 %v71_v9, %v39_v10 }
  0xa2   :  { %v42_v12 = vrot.slane %v41_v11, 4 }
  0xa4   :  { %v43_v13 = vadd.f32 %v42_v12, %v41_v11 }
  0xa6   :  { %v44_v14 = vrot.slane %v43_v13, 2 }
  0xa8   :  { %v45_v15 = vadd.f32 %v44_v14, %v43_v13 }
  0xaa   :  { %v46_v16 = vrot.slane %v45_v15, 1 }
  0xac   :  { %v47_v17 = vadd.f32 %v46_v16, %v45_v15 }
  0xae   :  { %48 = vst [vmem:[#allocation2] sm:$0x1] %v47_v17 }
  0xaf   :  { %83 = shalt.err (!%p80_p4)
}
  0xb0   :  { %58 = dma.vmem_to_hbm [thread:$0]  %s56_s2, 16, %s131_s3, [#allocation3]  }
  0xb1   :  { %92 = dma.done.wait [#allocation3], 16  }
  0xb2   :  { %93 = vsyncadd [#allocation3], 4294967280 }
  0xb3   :  { %62 = vsyncpa [#allocation3], 1 }

</bundles_post_ra>
